<compile_context>
chip_gen: v6e
topology: v6e:2x2x1
jax: 0.10.0
libtpu: 0.0.40
codegen_flags: <defaults>
</compile_context>

<pallas_src>
import jax
import jax.numpy as jnp
from jax.experimental import pallas as pl
from jax.experimental.pallas import tpu as pltpu

_LANE = 128
_SUBLANE = 8


def _round_up(x, m):
    return ((x + m - 1) // m) * m


def _vmem_capacity_bytes():
    """Per-generation VMEM capacity; falls back to the smallest (v7x 64 MiB/TC)."""
    try:
        cap = int(pltpu.get_tpu_info().vmem_capacity_bytes)
        if cap > 0:
            return cap
    except Exception:
        pass
    return 64 * 1024 * 1024


def _make_mlp_kernel(n_layers):
    """Full MLP forward for one batch tile (all layers fused)."""

    def kernel(*refs):
        # refs: x_ref, w0, b0, ..., w_{L-1}, b_{L-1}, out_ref
        x_ref = refs[0]
        out_ref = refs[-1]
        param_refs = refs[1:-1]

        h = x_ref[...].astype(jnp.float32)               # (TILE_B, in_dim)
        for i in range(n_layers):
            w = param_refs[2 * i][...]                   # (k_i, out_pad_i)
            b = param_refs[2 * i + 1][...]               # (1, out_pad_i)
            h = jnp.dot(h, w, preferred_element_type=jnp.float32) + b
            if i < n_layers - 1:                         # ReLU on all but last layer
                h = jnp.maximum(h, 0.0)

        # sigmoid(h) > 0.5  <=>  h > 0  (exact in f32, strict inequality)
        out_ref[...] = (h > 0.0).astype(jnp.int8)

    return kernel


def prepare_params(weights, biases):
    """One-time prep: transpose to (in, out); zero-pad OUTPUT features to x128.

    Layer 0 keeps its K dim exact (= in_dim) so x needs no feature padding.
    Padded lanes carry exact zeros through every Linear/ReLU (zero weight
    rows/cols and zero bias lanes) and are sliced off at the end.
    """
    params, dims = [], []
    prev_out_pad = None
    for li, (w, b) in enumerate(zip(weights, biases)):
        w = jnp.asarray(w, jnp.float32)
        b = jnp.asarray(b, jnp.float32)
        out_d, in_d = w.shape
        k = in_d if li == 0 else prev_out_pad            # match previous layer's lanes
        out_p = _round_up(out_d, _LANE)
        w_t = jnp.zeros((k, out_p), jnp.float32).at[:in_d, :out_d].set(w.T)
        b_p = jnp.zeros((1, out_p), jnp.float32).at[:, :out_d].set(b.reshape(1, -1))
        params.extend([w_t, b_p])
        dims.append((in_d, out_d, k, out_p))
        prev_out_pad = out_p
    return params, dims


def _estimate_vmem(tile_b, in_lane_pad, out_pad, max_feat_pad, param_bytes):
    x_bufs = 2 * tile_b * in_lane_pad * 4     # double-buffered x tiles (f32, lane-padded in VMEM)
    o_bufs = 2 * tile_b * out_pad * 1         # double-buffered out tiles (int8)
    act = 3 * tile_b * max_feat_pad * 4       # live intermediate activations (headroom)
    return 2 * param_bytes + x_bufs + o_bufs + act   # params are double-buffered too


def _pick_tile_b(batch_pad8, in_lane_pad, out_pad, max_feat_pad, param_bytes, soft_budget):
    tb = 4096                                  # byte-sized start (~2 MiB f32 tile at 128 lanes)
    while tb > 256 and _estimate_vmem(tb, in_lane_pad, out_pad,
                                      max_feat_pad, param_bytes) > soft_budget:
        tb //= 2
    tb = max(min(tb, batch_pad8), _SUBLANE)    # clamp to batch; keep multiple of 8
    return tb, _estimate_vmem(tb, in_lane_pad, out_pad, max_feat_pad, param_bytes)


def make_nn_forward(weights, biases):
    """Prepare params once, return a jitted forward(x) -> bool (batch, out_dim)."""
    params, dims = prepare_params(weights, biases)
    n_layers = len(weights)
    in_dim = dims[0][0]
    out_dim, out_pad = dims[-1][1], dims[-1][3]
    in_lane_pad = _round_up(max(in_dim, 1), _LANE)
    max_feat_pad = max(max(d[3] for d in dims), in_lane_pad)
    param_bytes = sum(int(p.size) * p.dtype.itemsize for p in params)
    kernel = _make_mlp_kernel(n_layers)

    vmem_cap = _vmem_capacity_bytes()
    soft_budget = max(int(0.40 * vmem_cap), 16 * 1024 * 1024)
    hard_cap = int(0.85 * vmem_cap)
    # TODO(synk): if 2*param_bytes alone exceeds soft_budget (very wide hidden
    # layers), fall back to a K/N-tiled per-layer matmul grid (reduction axis
    # last, f32 acc scratch, pl.when init/finalize) instead of keeping the whole
    # net VMEM-resident.

    @jax.jit
    def forward(x):
        batch = x.shape[0]
        batch_pad8 = _round_up(batch, _SUBLANE)

        xf = x.astype(jnp.float32)
        if batch != batch_pad8:                # rare: only to satisfy the 8-sublane rule
            xf = jnp.pad(xf, ((0, batch_pad8 - batch), (0, 0)))

        tile_b, est = _pick_tile_b(batch_pad8, in_lane_pad, out_pad,
                                   max_feat_pad, param_bytes, soft_budget)
        grid = (pl.cdiv(batch_pad8, tile_b),)

        # x/out tiled over the batch grid (last dim of x block == full array dim,
        # so no 128-lane padding needed); params full-extent + VMEM-resident.
        in_specs = [pl.BlockSpec((tile_b, in_dim), lambda i: (i, 0))]
        for p in params:
            in_specs.append(pl.BlockSpec(p.shape, lambda i: (0, 0)))

        # Always set an explicit VMEM limit (v5e default scoped limit is 16 MiB),
        # generous but capped below the per-TC physical capacity.
        vmem_limit = int(min(hard_cap, max(2 * est, 32 * 1024 * 1024)))

        out_i8 = pl.pallas_call(
            kernel,
            grid=grid,
            out_shape=jax.ShapeDtypeStruct((batch_pad8, out_pad), jnp.int8),
            in_specs=in_specs,
            out_specs=pl.BlockSpec((tile_b, out_pad), lambda i: (i, 0)),
            compiler_params=pltpu.CompilerParams(
                dimension_semantics=("parallel",),
                vmem_limit_bytes=vmem_limit,
            ),
        )(xf, *params)

        # Slice off padding; consumers that accept int8 can skip the bool view.
        return out_i8[:batch, :out_dim].astype(jnp.bool_)

    return forward


def nn_forward(x, weights, biases):
    """Convenience one-shot entry point (prefer make_nn_forward to hoist prep)."""
    return make_nn_forward(weights, biases)(x)


def init_params(nn_format, key):
    """Deterministic PyTorch-style Linear init: U(-1/sqrt(in), 1/sqrt(in))."""
    weights, biases = [], []
    for in_dim, out_dim in zip(nn_format[:-1], nn_format[1:]):
        key, kw, kb = jax.random.split(key, 3)
        bound = 1.0 / jnp.sqrt(jnp.float32(in_dim))
        weights.append(jax.random.uniform(kw, (out_dim, in_dim), jnp.float32, -bound, bound))
        biases.append(jax.random.uniform(kb, (out_dim,), jnp.float32, -bound, bound))
    return weights, biases


def reference_forward(x, weights, biases):
    """Pure-JAX reference matching the PyTorch module semantics."""
    h = x
    n = len(weights)
    for i, (w, b) in enumerate(zip(weights, biases)):
        h = h @ w.T + b
        if i < n - 1:
            h = jnp.maximum(h, 0.0)
    return jax.nn.sigmoid(h) > 0.5


if __name__ == "__main__":
    # Small shapes consistent with the module: nn_format = [in, hidden..., out]
    nn_format = [32, 64, 32, 8]

    key = jax.random.PRNGKey(0)
    weights, biases = init_params(nn_format, key)
    forward = make_nn_forward(weights, biases)   # params prepped once, jitted

    ok = True
    for batch in (4, 16):                        # exercise ragged (pad-to-8) and exact paths
        key, kx = jax.random.split(key)
        x = jax.random.normal(kx, (batch, nn_format[0]), jnp.float32)
        out = jax.block_until_ready(forward(x))
        ref = reference_forward(x, weights, biases)
        ok &= out.shape == (batch, nn_format[-1])
        ok &= out.dtype == jnp.bool_
        ok &= bool(jnp.all(out == ref))

    assert ok, "Pallas output mismatch vs reference"
    print("KERNEL_OK")
</pallas_src>

<mosaic_0001>
module attributes {stable_mosaic.version = 11 : i64} {
  func.func @kernel(%arg0: i32, %arg1: memref<8x32xf32, #tpu.memory_space<vmem>>, %arg2: memref<32x128xf32, #tpu.memory_space<vmem>>, %arg3: memref<1x128xf32, #tpu.memory_space<vmem>>, %arg4: memref<128x128xf32, #tpu.memory_space<vmem>>, %arg5: memref<1x128xf32, #tpu.memory_space<vmem>>, %arg6: memref<128x128xf32, #tpu.memory_space<vmem>>, %arg7: memref<1x128xf32, #tpu.memory_space<vmem>>, %arg8: memref<8x128xi8, #tpu.memory_space<vmem>>) attributes {dimension_semantics = [#tpu.dimension_semantics<parallel>], iteration_bounds = array<i64: 1>, scalar_prefetch = 0 : i64, scratch_operands = 0 : i64, tpu.core_type = #tpu.core_type<tc>, window_params = [{transform_indices = @transform_0, window_bounds = array<i64: 8, 32>}, {pipeline_mode = #tpu.pipeline_mode<synchronous>, transform_indices = @transform_1, window_bounds = array<i64: 32, 128>}, {pipeline_mode = #tpu.pipeline_mode<synchronous>, transform_indices = @transform_2, window_bounds = array<i64: 1, 128>}, {pipeline_mode = #tpu.pipeline_mode<synchronous>, transform_indices = @transform_3, window_bounds = array<i64: 128, 128>}, {pipeline_mode = #tpu.pipeline_mode<synchronous>, transform_indices = @transform_4, window_bounds = array<i64: 1, 128>}, {pipeline_mode = #tpu.pipeline_mode<synchronous>, transform_indices = @transform_5, window_bounds = array<i64: 128, 128>}, {pipeline_mode = #tpu.pipeline_mode<synchronous>, transform_indices = @transform_6, window_bounds = array<i64: 1, 128>}, {transform_indices = @transform_7, window_bounds = array<i64: 8, 128>}]} {
    %c0 = arith.constant 0 : index
    %c0_0 = arith.constant 0 : index
    %0 = vector.load %arg1[%c0, %c0_0] : memref<8x32xf32, #tpu.memory_space<vmem>>, vector<8x32xf32>
    %c0_1 = arith.constant 0 : index
    %c0_2 = arith.constant 0 : index
    %1 = vector.load %arg2[%c0_1, %c0_2] : memref<32x128xf32, #tpu.memory_space<vmem>>, vector<32x128xf32>
    %c0_3 = arith.constant 0 : index
    %c0_4 = arith.constant 0 : index
    %2 = vector.load %arg3[%c0_3, %c0_4] : memref<1x128xf32, #tpu.memory_space<vmem>>, vector<1x128xf32>
    %cst = arith.constant dense<0.000000e+00> : vector<8x128xf32>
    %3 = tpu.matmul %0, %1, %cst {dimension_numbers = #tpu.dot_dimension_numbers<[1], [0], [0], [1], [0, 0, 1, 1], [], []>} : vector<8x32xf32>, vector<32x128xf32>, vector<8x128xf32> -> vector<8x128xf32>
    %4 = vector.broadcast %2 : vector<1x128xf32> to vector<8x128xf32>
    %5 = arith.addf %3, %4 : vector<8x128xf32>
    %cst_5 = arith.constant 0.000000e+00 : f32
    %6 = vector.broadcast %cst_5 : f32 to vector<8x128xf32>
    %7 = arith.maximumf %5, %6 : vector<8x128xf32>
    %c0_6 = arith.constant 0 : index
    %c0_7 = arith.constant 0 : index
    %8 = vector.load %arg4[%c0_6, %c0_7] : memref<128x128xf32, #tpu.memory_space<vmem>>, vector<128x128xf32>
    %c0_8 = arith.constant 0 : index
    %c0_9 = arith.constant 0 : index
    %9 = vector.load %arg5[%c0_8, %c0_9] : memref<1x128xf32, #tpu.memory_space<vmem>>, vector<1x128xf32>
    %cst_10 = arith.constant dense<0.000000e+00> : vector<8x128xf32>
    %10 = tpu.matmul %7, %8, %cst_10 {dimension_numbers = #tpu.dot_dimension_numbers<[1], [0], [0], [1], [0, 0, 1, 1], [], []>} : vector<8x128xf32>, vector<128x128xf32>, vector<8x128xf32> -> vector<8x128xf32>
    %11 = vector.broadcast %9 : vector<1x128xf32> to vector<8x128xf32>
    %12 = arith.addf %10, %11 : vector<8x128xf32>
    %cst_11 = arith.constant 0.000000e+00 : f32
    %13 = vector.broadcast %cst_11 : f32 to vector<8x128xf32>
    %14 = arith.maximumf %12, %13 : vector<8x128xf32>
    %c0_12 = arith.constant 0 : index
    %c0_13 = arith.constant 0 : index
    %15 = vector.load %arg6[%c0_12, %c0_13] : memref<128x128xf32, #tpu.memory_space<vmem>>, vector<128x128xf32>
    %c0_14 = arith.constant 0 : index
    %c0_15 = arith.constant 0 : index
    %16 = vector.load %arg7[%c0_14, %c0_15] : memref<1x128xf32, #tpu.memory_space<vmem>>, vector<1x128xf32>
    %cst_16 = arith.constant dense<0.000000e+00> : vector<8x128xf32>
    %17 = tpu.matmul %14, %15, %cst_16 {dimension_numbers = #tpu.dot_dimension_numbers<[1], [0], [0], [1], [0, 0, 1, 1], [], []>} : vector<8x128xf32>, vector<128x128xf32>, vector<8x128xf32> -> vector<8x128xf32>
    %18 = vector.broadcast %16 : vector<1x128xf32> to vector<8x128xf32>
    %19 = arith.addf %17, %18 : vector<8x128xf32>
    %cst_17 = arith.constant 0.000000e+00 : f32
    %20 = vector.broadcast %cst_17 : f32 to vector<8x128xf32>
    %21 = arith.cmpf ogt, %19, %20 : vector<8x128xf32>
    %22 = arith.extui %21 : vector<8x128xi1> to vector<8x128xi8>
    %c0_18 = arith.constant 0 : index
    %c0_19 = arith.constant 0 : index
    %23 = vector.load %arg8[%c0_18, %c0_19] : memref<8x128xi8, #tpu.memory_space<vmem>>, vector<8x128xi8>
    tpu.vector_store %arg8[%c0_18, %c0_19], %22 {strides = array<i32>} : memref<8x128xi8, #tpu.memory_space<vmem>>, vector<8x128xi8>,
    return
  }
  func.func @transform_0(%arg0: i32) -> (i32, i32) {
    %c0_i32 = arith.constant 0 : i32
    %c0_i32_0 = arith.constant 0 : i32
    return %arg0, %c0_i32 : i32, i32
  }
  func.func @transform_1(%arg0: i32) -> (i32, i32) {
    %c0_i32 = arith.constant 0 : i32
    %c0_i32_0 = arith.constant 0 : i32
    %c0_i32_1 = arith.constant 0 : i32
    return %c0_i32, %c0_i32_0 : i32, i32
  }
  func.func @transform_2(%arg0: i32) -> (i32, i32) {
    %c0_i32 = arith.constant 0 : i32
    %c0_i32_0 = arith.constant 0 : i32
    %c0_i32_1 = arith.constant 0 : i32
    return %c0_i32, %c0_i32_0 : i32, i32
  }
  func.func @transform_3(%arg0: i32) -> (i32, i32) {
    %c0_i32 = arith.constant 0 : i32
    %c0_i32_0 = arith.constant 0 : i32
    %c0_i32_1 = arith.constant 0 : i32
    return %c0_i32, %c0_i32_0 : i32, i32
  }
  func.func @transform_4(%arg0: i32) -> (i32, i32) {
    %c0_i32 = arith.constant 0 : i32
    %c0_i32_0 = arith.constant 0 : i32
    %c0_i32_1 = arith.constant 0 : i32
    return %c0_i32, %c0_i32_0 : i32, i32
  }
  func.func @transform_5(%arg0: i32) -> (i32, i32) {
    %c0_i32 = arith.constant 0 : i32
    %c0_i32_0 = arith.constant 0 : i32
    %c0_i32_1 = arith.constant 0 : i32
    return %c0_i32, %c0_i32_0 : i32, i32
  }
  func.func @transform_6(%arg0: i32) -> (i32, i32) {
    %c0_i32 = arith.constant 0 : i32
    %c0_i32_0 = arith.constant 0 : i32
    %c0_i32_1 = arith.constant 0 : i32
    return %c0_i32, %c0_i32_0 : i32, i32
  }
  func.func @transform_7(%arg0: i32) -> (i32, i32) {
    %c0_i32 = arith.constant 0 : i32
    %c0_i32_0 = arith.constant 0 : i32
    return %arg0, %c0_i32 : i32, i32
  }
}

</mosaic_0001>

<bundles_post_ra>
// kernel: forward.1
= control target key start
LH: loop header
LB: loop body
LE: loop exit
PB: predicated region body
PF: predicated region fallthrough
CT: control target
= control target key end

     0   :  { %12 = vsyncpa [#allocation3], 0  ;;  %s664_s0 = inlined_call_operand.vmem [shape: f32[8,32], index: 0, kind: input, shape index: {}]   ;;  %s665_s1 = inlined_call_operand.hbm [shape: f32[32,128], index: 1, kind: input, shape index: {}]   ;;  %s666_s2 = inlined_call_operand.vmem [shape: f32[1,128], index: 2, kind: input, shape index: {}]   ;;  %s667_s3 = inlined_call_operand.hbm [shape: f32[128,128], index: 3, kind: input, shape index: {}]   ;;  %s668_s4 = inlined_call_operand.vmem [shape: f32[1,128], index: 4, kind: input, shape index: {}]   ;;  %s669_s5 = inlined_call_operand.hbm [shape: f32[128,128], index: 5, kind: input, shape index: {}]   ;;  %s670_s6 = inlined_call_operand.vmem [shape: f32[1,128], index: 6, kind: input, shape index: {}]   ;;  %s671_s7 = inlined_call_operand.vmem [shape: s8[8,128], index: 7, kind: output, shape index: {}]  }
   0x1   :  { %13 = vsyncpa [#allocation5], 0  ;;  %s550_s24 = smov [#allocation4]   ;;  %s551_s26 = smov [#allocation2]  }
   0x2   :  { %s35_s25 = sshll.u32 %s550_s24, 4  ;;  %s21_s27 = sshll.u32 %s551_s26, 4  ;;  %s36_s25 = int_to_ptr.vmem [resolvable:$true] %s35_s25  ;;  %s22_s27 = int_to_ptr.vmem [resolvable:$true] %s21_s27 }
   0x3   :  { %s494_s28 = scalar_lea.vmem %s36_s25, 2048  ;;  %p499_p1 = scmp.lt.s32.totalorder %s36_s25, %s36_s25 }
   0x4   :  { %p495_p0 = scmp.ne.s32.totalorder %s36_s25, %s494_s28  ;;  %p500_p2 = scmp.lt.s32.totalorder %s494_s28, %s494_s28 }
   0x6   :  { %p501_p3 = por %p500_p2, %p499_p1 }
   0x8   :  { %p502_p4 = pnand %p501_p3, %p495_p0 }
   0xa   :  { %505 = shalt.err (!%p502_p4)
}
   0xb   :  { %s552_s29 = smov 128   ;;  %s553_s30 = smov 8  }
   0xc   :  { %41 = dma.hbm_to_vmem [thread:$0]  %s667_s3, 2048, %s36_s25, [#allocation5], %s552_s29, %s552_s29, %s553_s30  }
   0xd   :  { %s514_s10 = scalar_lea.vmem %s22_s27, 512  ;;  %p519_p6 = scmp.lt.s32.totalorder %s22_s27, %s22_s27 }
   0xe   :  { %p515_p5 = scmp.ne.s32.totalorder %s22_s27, %s514_s10  ;;  %p520_p7 = scmp.lt.s32.totalorder %s514_s10, %s514_s10 }
  0x10   :  { %p521_p8 = por %p520_p7, %p519_p6 }
  0x12   :  { %p522_p9 = pnand %p521_p8, %p515_p5 }
  0x14   :  { %525 = shalt.err (!%p522_p9)
}
  0x15   :  { %27 = dma.hbm_to_vmem [thread:$0]  %s665_s1, 512, %s22_s27, [#allocation3], %s552_s29, %s552_s29, %s553_s30  }
  0x16   :  { %s554_s13 = smov [#allocation6]  }
  0x17   :  { %s49_s14 = sshll.u32 %s554_s13, 4  ;;  %s50_s14 = int_to_ptr.vmem [resolvable:$true] %s49_s14 }
  0x18   :  { %s534_s15 = scalar_lea.vmem %s50_s14, 2048  ;;  %p539_p11 = scmp.lt.s32.totalorder %s50_s14, %s50_s14 }
  0x19   :  { %p535_p10 = scmp.ne.s32.totalorder %s50_s14, %s534_s15  ;;  %p540_p12 = scmp.lt.s32.totalorder %s534_s15, %s534_s15 }
  0x1b   :  { %p541_p13 = por %p540_p12, %p539_p11 }
  0x1d   :  { %p542_p0 = pnand %p541_p13, %p535_p10 }
  0x1f   :  { %545 = shalt.err (!%p542_p0)
}
  0x20   :  { %55 = dma.hbm_to_vmem [thread:$0]  %s669_s5, 2048, %s50_s14, [#allocation5], %s552_s29, %s552_s29, %s553_s30  }
  0x21   :  { %546 = dma.done.wait [#allocation3], 512  }
  0x22   :  { %547 = vsyncadd [#allocation3], 4294966784 }
  0x23   :  { %548 = dma.done.wait [#allocation5], 4096  }
  0x24   :  { %549 = vsyncadd [#allocation5], 4294963200  ;;  %v555_v0 = vmov 0.0   ;;  %vm556_vm0 = vmmov 0   ;;  %v73_v1 = vld [vmem:[#allocation2 + $0x18] sm:$0xff]  ;;  %v72_v2 = vld [vmem:[#allocation2 + $0x10] sm:$0xff] }
  0x25   :  { %397 = vmatprep.subr.mxu0 %v555_v0  ;;  %405 = vmatprep.mubr.msk.f32.mxu0 %vm556_vm0, %v555_v0  ;;  %v171_v3 = vld [vmem:[#allocation4 + $0x78] sm:$0xff]  ;;  %v71_v4 = vld [vmem:[#allocation2 + $0x8] sm:$0xff]  ;;  %v170_v5 = vld [vmem:[#allocation4 + $0x70] sm:$0xff]  ;;  %vm81_vm1 = vcmask 261120   ;;  %v557_v52 = vmov 0  }
  0x26   :  { %408 = vmatprep.subr.mxu1 %v555_v0  ;;  %440 = vmatprep.mubr.msk.f32.mxu1 %vm556_vm0, %v555_v0  ;;  %v169_v6 = vld [vmem:[#allocation4 + $0x68] sm:$0xff]  ;;  %v70_v7 = vld [vmem:[#allocation2] sm:$0xff]  ;;  %v167_v10 = vld [vmem:[#allocation4 + $0x58] sm:$0xff] }
  0x27   :  { %398 = vmatpush3.msra.mxu0 %v73_v1  ;;  %409 = vmatpush3.msra.mxu1 %v171_v3  ;;  %v69_v8 = vld [vmem:[%s664_s0] sm:$0xff]  ;;  %v166_v11 = vld [vmem:[#allocation4 + $0x50] sm:$0xff]  ;;  %v165_v12 = vld [vmem:[#allocation4 + $0x48] sm:$0xff] }
  0x28   :  { %399 = vmatprep.subr.mxu0 %v555_v0  ;;  %410 = vmatprep.subr.mxu1 %v555_v0  ;;  %v168_v9 = vld [vmem:[#allocation4 + $0x60] sm:$0xff]  ;;  %v163_v14 = vld [vmem:[#allocation4 + $0x38] sm:$0xff]  ;;  %v162_v15 = vld [vmem:[#allocation4 + $0x30] sm:$0xff] }
  0x29   :  { %400 = vmatpush3.msra.mxu0 %v72_v2  ;;  %411 = vmatpush3.msra.mxu1 %v170_v5  ;;  %v164_v13 = vld [vmem:[#allocation4 + $0x40] sm:$0xff]  ;;  %v161_v16 = vld [vmem:[#allocation4 + $0x28] sm:$0xff]  ;;  %v159_v18 = vld [vmem:[#allocation4 + $0x18] sm:$0xff] }
  0x2a   :  { %401 = vmatprep.subr.mxu0 %v555_v0  ;;  %412 = vmatprep.subr.mxu1 %v555_v0  ;;  %v160_v17 = vld [vmem:[#allocation4 + $0x20] sm:$0xff]  ;;  %v158_v19 = vld [vmem:[#allocation4 + $0x10] sm:$0xff]  ;;  %v157_v20 = vld [vmem:[#allocation4 + $0x8] sm:$0xff] }
  0x2b   :  { %402 = vmatpush3.msra.mxu0 %v71_v4  ;;  %413 = vmatpush3.msra.mxu1 %v169_v6  ;;  %v156_v21 = vld [vmem:[#allocation4] sm:$0xff]  ;;  %v265_v22 = vld [vmem:[#allocation6 + $0x78] sm:$0xff]  ;;  %v264_v23 = vld [vmem:[#allocation6 + $0x70] sm:$0xff] }
  0x2c   :  { %403 = vmatprep.subr.mxu0 %v555_v0  ;;  %414 = vmatprep.subr.mxu1 %v555_v0  ;;  %v263_v24 = vld [vmem:[#allocation6 + $0x68] sm:$0xff]  ;;  %v262_v25 = vld [vmem:[#allocation6 + $0x60] sm:$0xff]  ;;  %v261_v26 = vld [vmem:[#allocation6 + $0x58] sm:$0xff] }
  0x2d   :  { %404 = vmatpush3.msra.mxu0 %v70_v7  ;;  %415 = vmatpush3.msra.mxu1 %v168_v9  ;;  %v260_v27 = vld [vmem:[#allocation6 + $0x50] sm:$0xff]  ;;  %v259_v28 = vld [vmem:[#allocation6 + $0x48] sm:$0xff]  ;;  %v258_v29 = vld [vmem:[#allocation6 + $0x40] sm:$0xff] }
  0x2e   :  { %406 = vmatmul.mubr.msk.f32.vlgmr.msra.gmra.mxu0 %vm81_vm1, %v69_v8  ;;  %416 = vmatprep.subr.mxu1 %v555_v0  ;;  %v257_v30 = vld [vmem:[#allocation6 + $0x38] sm:$0xff]  ;;  %v256_v31 = vld [vmem:[#allocation6 + $0x30] sm:$0xff]  ;;  %v255_v32 = vld [vmem:[#allocation6 + $0x28] sm:$0xff] }
  0x2f   :  { %443 = vmatprep.subr.mxu0 %v555_v0  ;;  %417 = vmatpush3.msra.mxu1 %v167_v10  ;;  %v254_v33 = vld [vmem:[#allocation6 + $0x20] sm:$0xff]  ;;  %v253_v34 = vld [vmem:[#allocation6 + $0x18] sm:$0xff]  ;;  %v252_v40 = vld [vmem:[#allocation6 + $0x10] sm:$0xff] }
  0x30   :  { %475 = vmatprep.mubr.msk.f32.mxu0 %vm556_vm0, %v555_v0  ;;  %418 = vmatprep.subr.mxu1 %v555_v0  ;;  %v354_v35 = vld [vmem:[%s666_s2] ss:$0 sm:$0xff]  ;;  %v251_v41 = vld [vmem:[#allocation6 + $0x8] sm:$0xff] }
  0x31   :  { %419 = vmatpush3.msra.mxu1 %v166_v11  ;;  %444 = vmatpush3.msra.mxu0 %v265_v22  ;;  %v250_v42 = vld [vmem:[#allocation6] sm:$0xff] }
  0x32   :  { %420 = vmatprep.subr.mxu1 %v555_v0  ;;  %445 = vmatprep.subr.mxu0 %v555_v0  ;;  %v356_v43 = vld [vmem:[%s668_s4] ss:$0 sm:$0xff] }
  0x33   :  { %421 = vmatpush3.msra.mxu1 %v165_v12  ;;  %446 = vmatpush3.msra.mxu0 %v264_v23  ;;  %v357_v48 = vld [vmem:[%s670_s6] ss:$0 sm:$0xff] }
  0x34   :  { %422 = vmatprep.subr.mxu1 %v555_v0  ;;  %447 = vmatprep.subr.mxu0 %v555_v0 }
  0x35   :  { %423 = vmatpush3.msra.mxu1 %v164_v13  ;;  %448 = vmatpush3.msra.mxu0 %v263_v24 }
  0x36   :  { %424 = vmatprep.subr.mxu1 %v555_v0  ;;  %449 = vmatprep.subr.mxu0 %v555_v0 }
  0x37   :  { %425 = vmatpush3.msra.mxu1 %v163_v14  ;;  %450 = vmatpush3.msra.mxu0 %v262_v25 }
  0x38   :  { %426 = vmatprep.subr.mxu1 %v555_v0  ;;  %451 = vmatprep.subr.mxu0 %v555_v0 }
  0x39   :  { %427 = vmatpush3.msra.mxu1 %v162_v15  ;;  %452 = vmatpush3.msra.mxu0 %v261_v26 }
  0x3a   :  { %428 = vmatprep.subr.mxu1 %v555_v0  ;;  %453 = vmatprep.subr.mxu0 %v555_v0 }
  0x3b   :  { %429 = vmatpush3.msra.mxu1 %v161_v16  ;;  %454 = vmatpush3.msra.mxu0 %v260_v27 }
  0x3c   :  { %430 = vmatprep.subr.mxu1 %v555_v0  ;;  %455 = vmatprep.subr.mxu0 %v555_v0 }
  0x3d   :  { %431 = vmatpush3.msra.mxu1 %v160_v17  ;;  %456 = vmatpush3.msra.mxu0 %v259_v28 }
  0x3e   :  { %432 = vmatprep.subr.mxu1 %v555_v0  ;;  %457 = vmatprep.subr.mxu0 %v555_v0 }
  0x3f   :  { %433 = vmatpush3.msra.mxu1 %v159_v18  ;;  %458 = vmatpush3.msra.mxu0 %v258_v29 }
  0x40   :  { %434 = vmatprep.subr.mxu1 %v555_v0  ;;  %459 = vmatprep.subr.mxu0 %v555_v0 }
  0x41   :  { %435 = vmatpush3.msra.mxu1 %v158_v19  ;;  %460 = vmatpush3.msra.mxu0 %v257_v30 }
  0x42   :  { %436 = vmatprep.subr.mxu1 %v555_v0  ;;  %461 = vmatprep.subr.mxu0 %v555_v0 }
  0x43   :  { %437 = vmatpush3.msra.mxu1 %v157_v20  ;;  %462 = vmatpush3.msra.mxu0 %v256_v31 }
  0x44   :  { %438 = vmatprep.subr.mxu1 %v555_v0  ;;  %463 = vmatprep.subr.mxu0 %v555_v0 }
  0x45   :  { %439 = vmatpush3.msra.mxu1 %v156_v21  ;;  %464 = vmatpush3.msra.mxu0 %v255_v32 }
  0x46   :  { %465 = vmatprep.subr.mxu0 %v555_v0 }
  0x47   :  { %466 = vmatpush3.msra.mxu0 %v254_v33 }
  0x48   :  { %467 = vmatprep.subr.mxu0 %v555_v0 }
  0x49   :  { %468 = vmatpush3.msra.mxu0 %v253_v34 }
  0x4a   :  { %469 = vmatprep.subr.mxu0 %v555_v0 }
  0x4b   :  { %470 = vmatpush3.msra.mxu0 %v252_v40 }
  0x4c   :  { %471 = vmatprep.subr.mxu0 %v555_v0 }
  0x4d   :  { %472 = vmatpush3.msra.mxu0 %v251_v41 }
  0x4e   :  { %473 = vmatprep.subr.mxu0 %v555_v0 }
  0x4f   :  { %474 = vmatpush3.msra.mxu0 %v250_v42 }
  0xee   :  { %v151_v36 = vpop.f32.mrf.mxu0 }
  0xef   :  { %v152_v37 = vadd.f32 %v354_v35, %v151_v36 }
  0xf0   :  { %v407_v38 = vpop.f32.mrf.mxu0 }
  0xf1   :  { %v155_v39 = vmax.f32 %v152_v37, 0.0 }
  0xf3   :  { %441 = vmatmul.mubr.f32.vlgmr.msra.gmra.mxu1 %v155_v39 }
 0x1b3   :  { %v245_v44 = vpop.f32.mrf.mxu1 }
 0x1b4   :  { %v246_v45 = vadd.f32 %v356_v43, %v245_v44 }
 0x1b5   :  { %v442_v46 = vpop.f32.mrf.mxu1 }
 0x1b6   :  { %v249_v47 = vmax.f32 %v246_v45, 0.0 }
 0x1b8   :  { %476 = vmatmul.mubr.f32.vlgmr.msra.gmra.mxu0 %v249_v47 }
 0x278   :  { %v339_v49 = vpop.f32.mrf.mxu0 }
 0x279   :  { %v340_v50 = vadd.f32 %v357_v48, %v339_v49 }
 0x27a   :  { %v477_v51 = vpop.f32.mrf.mxu0 }
 0x27b   :  { %vm343_vm2 = vcmp.gt.f32.partialorder %v340_v50, 0.0 }
 0x27c   :  { %vm344_vm3 = vmpackc.low %vm343_vm2, %vm343_vm2 }
 0x27d   :  { %vm345_vm4 = vmpackc.even %vm344_vm3, %vm344_vm3 }
 0x27e   :  { %v346_v53 = vsel %vm345_vm4, 16843009, %v557_v52 }
 0x27f   :  { %347 = vst [vmem:[%s671_s7] sm:$0x3] %v346_v53 }
 0x280   :  { %352 = vsyncpa [#allocation3], 1 }
 0x281   :  { %353 = vsyncpa [#allocation5], 1 }

</bundles_post_ra>
